<compile_context>
chip_gen: v7x
topology: tpu7x:2x2x1
jax: 0.10.0
libtpu: 0.0.40
codegen_flags: <defaults>
</compile_context>

<pallas_src>
import functools

import jax
import jax.numpy as jnp
from jax.experimental import pallas as pl
from jax.experimental.pallas import tpu as pltpu


def _round_up(x, m):
    return (x + m - 1) // m * m


def _gaussian_flat_kernel(x_ref, w_ref, b_ref, mask_ref, eps_ref,
                          stats_ref, samp_ref, *, ZY, sample):
    # x: (TM, D), w: (D, 2*ZY), b: (1, 2*ZY), mask: (TM, 1), eps: (TM, ZY)
    x = x_ref[...]
    w = w_ref[...]
    b = b_ref[...]
    mask = mask_ref[...]                                   # (TM, 1)

    # Fused four-way linear on the MXU, f32 accumulation.
    out = jnp.dot(x, w, preferred_element_type=jnp.float32) + b   # (TM, 2*ZY)
    # Single slab-wide mask multiply (one broadcast, one VPU pass).
    out = out * mask

    # Lane-dense store of all four masked statistics at once:
    #   [mean_qs | mean2_qs | logvar_qs | logvar2_qs]
    stats_ref[...] = out

    means = out[:, :ZY]
    if sample:
        logvars = out[:, ZY:]
        samp = (means + jnp.exp(0.5 * logvars) * eps_ref[...]) * mask
    else:
        samp = means * mask
    # Lane-dense store of [z | y].
    samp_ref[...] = samp


def gaussian_flat_layer_forward(inputs, mask, params, eps_z, eps_y, *, sample):
    """inputs: (B, T, D) f32, mask: (B, T) f32, eps_z: (B, T, Z), eps_y: (B, T, Y)."""
    B, T, D = inputs.shape
    Wz, bz, Wlz, blz, Wy, by, Wly, bly = params
    Z = Wz.shape[1]
    Y = Wy.shape[1]
    ZY = Z + Y
    N = 2 * ZY
    M = B * T

    # --- glue: flatten, concatenate, pad rows (plain JAX) -------------------
    x2d = inputs.reshape(M, D)
    mask2d = mask.reshape(M, 1)
    eps2d = jnp.concatenate([eps_z.reshape(M, Z), eps_y.reshape(M, Y)], axis=1)

    # Weight order: means first, logvars second -> only aligned half-slab
    # slices are needed inside the kernel.
    W = jnp.concatenate([Wz, Wy, Wlz, Wly], axis=1)                 # (D, 2*ZY)
    bias = jnp.concatenate([bz, by, blz, bly], axis=0)[None]        # (1, 2*ZY)

    # Row tile: multiple of 8 (f32 sublane), capped so it fits any VMEM budget
    # (v7x has 64 MiB physical / 32 MiB scoped).
    TM = min(512, _round_up(M, 8))
    Mp = _round_up(M, TM)
    if Mp != M:
        pad = Mp - M
        x2d = jnp.pad(x2d, ((0, pad), (0, 0)))
        mask2d = jnp.pad(mask2d, ((0, pad), (0, 0)))   # zero mask -> zero rows
        eps2d = jnp.pad(eps2d, ((0, pad), (0, 0)))
    grid = (Mp // TM,)

    kernel = functools.partial(_gaussian_flat_kernel, ZY=ZY, sample=sample)

    out_shapes = (
        jax.ShapeDtypeStruct((Mp, N), jnp.float32),    # stats  [mz|my|lz|ly]
        jax.ShapeDtypeStruct((Mp, ZY), jnp.float32),   # sample [z|y]
    )

    row_tiled = lambda cols: pl.BlockSpec((TM, cols), lambda i: (i, 0))
    resident = lambda r, c: pl.BlockSpec((r, c), lambda i: (0, 0))

    in_specs = [
        row_tiled(D),          # x
        resident(D, N),        # W  (stays in VMEM across grid steps)
        resident(1, N),        # bias
        row_tiled(1),          # mask
        row_tiled(ZY),         # eps
    ]
    out_specs = (
        row_tiled(N),          # stats
        row_tiled(ZY),         # sample
    )

    stats, samp = pl.pallas_call(
        kernel,
        out_shape=out_shapes,
        grid_spec=pltpu.PrefetchScalarGridSpec(
            num_scalar_prefetch=0,
            grid=grid,
            in_specs=in_specs,
            out_specs=out_specs,
        ),
        compiler_params=pltpu.CompilerParams(
            dimension_semantics=("parallel",),
        ),
    )(x2d, W, bias, mask2d, eps2d)

    # --- glue: slice packed slabs back into the six named outputs ----------
    stats = stats[:M]
    samp = samp[:M]
    mean_qs = stats[:, 0:Z]
    mean2_qs = stats[:, Z:ZY]
    logvar_qs = stats[:, ZY:ZY + Z]
    logvar2_qs = stats[:, ZY + Z:]
    z = samp[:, 0:Z]
    y = samp[:, Z:]

    return (
        z.reshape(B, T, Z),
        y.reshape(B, T, Y),
        mean_qs.reshape(B, T, Z),
        logvar_qs.reshape(B, T, Z),
        mean2_qs.reshape(B, T, Y),
        logvar2_qs.reshape(B, T, Y),
    )


def init_params(key, input_size, latent_z_size, latent_y_size):
    """Deterministic PyTorch-Linear-like init. Weights stored as (in, out)."""
    ks = jax.random.split(key, 8)

    def linear(kw, kb, fan_in, fan_out):
        bound = 1.0 / jnp.sqrt(fan_in)
        W = jax.random.uniform(kw, (fan_in, fan_out), jnp.float32, -bound, bound)
        b = jax.random.uniform(kb, (fan_out,), jnp.float32, -bound, bound)
        return W, b

    Wz, bz = linear(ks[0], ks[1], input_size, latent_z_size)
    Wlz, blz = linear(ks[2], ks[3], input_size, latent_z_size)
    Wy, by = linear(ks[4], ks[5], input_size, latent_y_size)
    Wly, bly = linear(ks[6], ks[7], input_size, latent_y_size)
    return (Wz, bz, Wlz, blz, Wy, by, Wly, bly)


if __name__ == "__main__":
    B, T, D = 2, 8, 32      # batch, batch_len, input_size
    Z, Y = 16, 16           # latent_z_size, latent_y_size

    key = jax.random.PRNGKey(0)
    k_in, k_mask, k_param, k_ez, k_ey = jax.random.split(key, 5)

    inputs = jax.random.normal(k_in, (B, T, D), jnp.float32)
    # 0/1 mask over time steps (like sequence padding mask).
    mask = (jax.random.uniform(k_mask, (B, T)) > 0.25).astype(jnp.float32)
    params = init_params(k_param, D, Z, Y)
    eps_z = jax.random.normal(k_ez, (B, T, Z), jnp.float32)
    eps_y = jax.random.normal(k_ey, (B, T, Y), jnp.float32)

    # Run the kernel (sample=True path exercises the reparameterized draw).
    outs = gaussian_flat_layer_forward(inputs, mask, params, eps_z, eps_y,
                                       sample=True)
    outs = jax.block_until_ready(outs)

    # Lightweight correctness check against a pure-JAX reference.
    Wz, bz, Wlz, blz, Wy, by, Wly, bly = params
    m = mask[..., None]
    mean_qs = (inputs @ Wz + bz) * m
    logvar_qs = (inputs @ Wlz + blz) * m
    mean2_qs = (inputs @ Wy + by) * m
    logvar2_qs = (inputs @ Wly + bly) * m
    z_ref = (mean_qs + jnp.exp(0.5 * logvar_qs) * eps_z) * m
    y_ref = (mean2_qs + jnp.exp(0.5 * logvar2_qs) * eps_y) * m
    refs = (z_ref, y_ref, mean_qs, logvar_qs, mean2_qs, logvar2_qs)
    for got, want in zip(outs, refs):
        assert jnp.allclose(got, want, atol=1e-5, rtol=1e-5), "mismatch"

    # Also check the sample=False path.
    outs_ns = gaussian_flat_layer_forward(inputs, mask, params, eps_z, eps_y,
                                          sample=False)
    outs_ns = jax.block_until_ready(outs_ns)
    refs_ns = (mean_qs * m, mean2_qs * m, mean_qs, logvar_qs, mean2_qs,
               logvar2_qs)
    for got, want in zip(outs_ns, refs_ns):
        assert jnp.allclose(got, want, atol=1e-5, rtol=1e-5), "mismatch"

    print("KERNEL_OK")
</pallas_src>

<mosaic_0001>
module attributes {stable_mosaic.version = 11 : i64} {
  func.func @_gaussian_flat_kernel(%arg0: i32, %arg1: memref<16x32xf32, #tpu.memory_space<vmem>>, %arg2: memref<32x64xf32, #tpu.memory_space<vmem>>, %arg3: memref<1x64xf32, #tpu.memory_space<vmem>>, %arg4: memref<16x1xf32, #tpu.memory_space<vmem>>, %arg5: memref<16x32xf32, #tpu.memory_space<vmem>>, %arg6: memref<16x64xf32, #tpu.memory_space<vmem>>, %arg7: memref<16x32xf32, #tpu.memory_space<vmem>>) attributes {dimension_semantics = [#tpu.dimension_semantics<parallel>], iteration_bounds = array<i64: 1>, scalar_prefetch = 0 : i64, scratch_operands = 0 : i64, tpu.core_type = #tpu.core_type<tc>, window_params = [{transform_indices = @transform_0, window_bounds = array<i64: 16, 32>}, {pipeline_mode = #tpu.pipeline_mode<synchronous>, transform_indices = @transform_1, window_bounds = array<i64: 32, 64>}, {pipeline_mode = #tpu.pipeline_mode<synchronous>, transform_indices = @transform_2, window_bounds = array<i64: 1, 64>}, {transform_indices = @transform_3, window_bounds = array<i64: 16, 1>}, {transform_indices = @transform_4, window_bounds = array<i64: 16, 32>}, {transform_indices = @transform_5, window_bounds = array<i64: 16, 64>}, {transform_indices = @transform_6, window_bounds = array<i64: 16, 32>}]} {
    %c0 = arith.constant 0 : index
    %c0_0 = arith.constant 0 : index
    %0 = vector.load %arg1[%c0, %c0_0] : memref<16x32xf32, #tpu.memory_space<vmem>>, vector<16x32xf32>
    %c0_1 = arith.constant 0 : index
    %c0_2 = arith.constant 0 : index
    %1 = vector.load %arg2[%c0_1, %c0_2] : memref<32x64xf32, #tpu.memory_space<vmem>>, vector<32x64xf32>
    %c0_3 = arith.constant 0 : index
    %c0_4 = arith.constant 0 : index
    %2 = vector.load %arg3[%c0_3, %c0_4] : memref<1x64xf32, #tpu.memory_space<vmem>>, vector<1x64xf32>
    %c0_5 = arith.constant 0 : index
    %c0_6 = arith.constant 0 : index
    %3 = vector.load %arg4[%c0_5, %c0_6] : memref<16x1xf32, #tpu.memory_space<vmem>>, vector<16x1xf32>
    %cst = arith.constant dense<0.000000e+00> : vector<16x64xf32>
    %4 = tpu.matmul %0, %1, %cst {dimension_numbers = #tpu.dot_dimension_numbers<[1], [0], [0], [1], [0, 0, 1, 1], [], []>} : vector<16x32xf32>, vector<32x64xf32>, vector<16x64xf32> -> vector<16x64xf32>
    %5 = vector.broadcast %2 : vector<1x64xf32> to vector<16x64xf32>
    %6 = arith.addf %4, %5 : vector<16x64xf32>
    %7 = vector.broadcast %3 : vector<16x1xf32> to vector<16x64xf32>
    %8 = arith.mulf %6, %7 : vector<16x64xf32>
    %c0_7 = arith.constant 0 : index
    %c0_8 = arith.constant 0 : index
    %9 = vector.load %arg6[%c0_7, %c0_8] : memref<16x64xf32, #tpu.memory_space<vmem>>, vector<16x64xf32>
    tpu.vector_store %arg6[%c0_7, %c0_8], %8 {strides = array<i32>} : memref<16x64xf32, #tpu.memory_space<vmem>>, vector<16x64xf32>,
    %10 = vector.extract_strided_slice %8 {offsets = [0, 0], sizes = [16, 32], strides = [1, 1]} : vector<16x64xf32> to vector<16x32xf32>
    %11 = vector.extract_strided_slice %8 {offsets = [0, 32], sizes = [16, 32], strides = [1, 1]} : vector<16x64xf32> to vector<16x32xf32>
    %cst_9 = arith.constant 5.000000e-01 : f32
    %12 = vector.broadcast %cst_9 : f32 to vector<16x32xf32>
    %13 = arith.mulf %12, %11 : vector<16x32xf32>
    %14 = math.exp %13 : vector<16x32xf32>
    %c0_10 = arith.constant 0 : index
    %c0_11 = arith.constant 0 : index
    %15 = vector.load %arg5[%c0_10, %c0_11] : memref<16x32xf32, #tpu.memory_space<vmem>>, vector<16x32xf32>
    %16 = arith.mulf %14, %15 : vector<16x32xf32>
    %17 = arith.addf %10, %16 : vector<16x32xf32>
    %18 = vector.broadcast %3 : vector<16x1xf32> to vector<16x32xf32>
    %19 = arith.mulf %17, %18 : vector<16x32xf32>
    %c0_12 = arith.constant 0 : index
    %c0_13 = arith.constant 0 : index
    %20 = vector.load %arg7[%c0_12, %c0_13] : memref<16x32xf32, #tpu.memory_space<vmem>>, vector<16x32xf32>
    tpu.vector_store %arg7[%c0_12, %c0_13], %19 {strides = array<i32>} : memref<16x32xf32, #tpu.memory_space<vmem>>, vector<16x32xf32>,
    return
  }
  func.func @transform_0(%arg0: i32) -> (i32, i32) {
    %c0_i32 = arith.constant 0 : i32
    %c0_i32_0 = arith.constant 0 : i32
    return %arg0, %c0_i32 : i32, i32
  }
  func.func @transform_1(%arg0: i32) -> (i32, i32) {
    %c0_i32 = arith.constant 0 : i32
    %c0_i32_0 = arith.constant 0 : i32
    %c0_i32_1 = arith.constant 0 : i32
    return %c0_i32, %c0_i32_0 : i32, i32
  }
  func.func @transform_2(%arg0: i32) -> (i32, i32) {
    %c0_i32 = arith.constant 0 : i32
    %c0_i32_0 = arith.constant 0 : i32
    %c0_i32_1 = arith.constant 0 : i32
    return %c0_i32, %c0_i32_0 : i32, i32
  }
  func.func @transform_3(%arg0: i32) -> (i32, i32) {
    %c0_i32 = arith.constant 0 : i32
    %c0_i32_0 = arith.constant 0 : i32
    return %arg0, %c0_i32 : i32, i32
  }
  func.func @transform_4(%arg0: i32) -> (i32, i32) {
    %c0_i32 = arith.constant 0 : i32
    %c0_i32_0 = arith.constant 0 : i32
    return %arg0, %c0_i32 : i32, i32
  }
  func.func @transform_5(%arg0: i32) -> (i32, i32) {
    %c0_i32 = arith.constant 0 : i32
    %c0_i32_0 = arith.constant 0 : i32
    return %arg0, %c0_i32 : i32, i32
  }
  func.func @transform_6(%arg0: i32) -> (i32, i32) {
    %c0_i32 = arith.constant 0 : i32
    %c0_i32_0 = arith.constant 0 : i32
    return %arg0, %c0_i32 : i32, i32
  }
}

</mosaic_0001>

<bundles_post_ra>
// kernel: tpu_custom_call.1
= control target key start
LH: loop header
LB: loop body
LE: loop exit
PB: predicated region body
PF: predicated region fallthrough
CT: control target
= control target key end

     0   :  { %12 = vsyncpa [#allocation3], 0  ;;  %s489_s0 = inlined_call_operand.vmem [shape: f32[16,32], index: 0, kind: input, shape index: {}]   ;;  %s490_s1 = inlined_call_operand.hbm [shape: f32[32,64], index: 1, kind: input, shape index: {}]   ;;  %s491_s2 = inlined_call_operand.hbm [shape: f32[1,64], index: 2, kind: input, shape index: {}]   ;;  %s492_s3 = inlined_call_operand.vmem [shape: f32[16,1], index: 3, kind: input, shape index: {}]   ;;  %s493_s4 = inlined_call_operand.vmem [shape: f32[16,32], index: 4, kind: input, shape index: {}]   ;;  %s494_s5 = inlined_call_operand.hbm [shape: f32[16,64], index: 5, kind: output, shape index: {0}]   ;;  %s495_s6 = inlined_call_operand.hbm [shape: f32[16,32], index: 6, kind: output, shape index: {1}]  }
   0x1   :  { %13 = vsyncpa [#allocation6], 0 }
   0x2   :  { %14 = vsyncpa [#allocation4], 0 }
   0x3   :  { %15 = vsyncpa [#allocation9], 0  ;;  %s366_s21 = smov [#allocation2]   ;;  %s270_s25 = scalar_lea.hbm %s490_s1, 512 }
   0x4   :  { %s23_s22 = sshll.u32 %s366_s21, 4  ;;  %p271_p0 = scmp.ne.s32.totalorder %s490_s1, %s270_s25  ;;  %s24_s22 = int_to_ptr.vmem [resolvable:$true] %s23_s22 }
   0x5   :  { %p274_p1 = scmp.lt.u32.totalorder %s270_s25, %s490_s1 }
   0x7   :  { %p276_p2 = pnand %p274_p1, %p271_p0 }
   0x9   :  { %279 = shalt.err (!%p276_p2)
}
   0xa   :  { %s280_s30 = scalar_lea.vmem %s24_s22, 512  ;;  %p285_p4 = scmp.lt.s32.totalorder %s24_s22, %s24_s22 }
   0xb   :  { %p281_p3 = scmp.ne.s32.totalorder %s24_s22, %s280_s30  ;;  %p286_p5 = scmp.lt.s32.totalorder %s280_s30, %s280_s30 }
   0xd   :  { %p287_p6 = por %p286_p5, %p285_p4 }
   0xf   :  { %p288_p7 = pnand %p287_p6, %p281_p3 }
  0x11   :  { %291 = shalt.err (!%p288_p7)
}
  0x12   :  { %s367_s7 = smov 128   ;;  %s368_s8 = smov 8  }
  0x13   :  { %29 = dma.hbm_to_vmem [thread:$0]  %s490_s1, 512, %s24_s22, [#allocation3], %s367_s7, %s367_s7, %s368_s8  }
  0x14   :  { %s369_s11 = smov [#allocation5]   ;;  %s292_s15 = scalar_lea.hbm %s491_s2, 16 }
  0x15   :  { %s36_s12 = sshll.u32 %s369_s11, 4  ;;  %p293_p8 = scmp.ne.s32.totalorder %s491_s2, %s292_s15  ;;  %s37_s12 = int_to_ptr.vmem [resolvable:$true] %s36_s12 }
  0x16   :  { %p296_p9 = scmp.lt.u32.totalorder %s292_s15, %s491_s2 }
  0x18   :  { %p298_p10 = pnand %p296_p9, %p293_p8 }
  0x1a   :  { %301 = shalt.err (!%p298_p10)
}
  0x1b   :  { %s302_s20 = scalar_lea.vmem %s37_s12, 16  ;;  %s306_s1 = scalar_lea.vmem %s37_s12, 32 }
  0x1c   :  { %p303_p11 = scmp.ne.s32.totalorder %s37_s12, %s302_s20  ;;  %p307_p12 = scmp.lt.s32.totalorder %s37_s12, %s37_s12 }
  0x1d   :  { %p308_p13 = scmp.lt.s32.totalorder %s306_s1, %s302_s20 }
  0x1f   :  { %p309_p0 = por %p308_p13, %p307_p12 }
  0x21   :  { %p310_p1 = pnand %p309_p0, %p303_p11 }
  0x23   :  { %313 = shalt.err (!%p310_p1)
}
  0x24   :  { %39 = dma.hbm_to_vmem [thread:$0]  %s491_s2, 16, %s37_s12, [#allocation6]  }
  0x25   :  { %358 = dma.done.wait [#allocation3], 512  }
  0x26   :  { %359 = vsyncadd [#allocation3], 4294966784 }
  0x27   :  { %360 = dma.done.wait [#allocation6], 16  }
  0x28   :  { %361 = vsyncadd [#allocation6], 4294967280  ;;  %v370_v0 = vmov 0   ;;  %vm65_vm0 = vcmask 261120   ;;  %v52_v1 = vld [vmem:[#allocation2] sm:$0xff]  ;;  %v53_v2 = vld [vmem:[#allocation2 + $0x8] sm:$0xff] }
  0x29   :  { %265 = vset.pattern.permute.xlu0 %v370_v0  ;;  %v54_v3 = vld [vmem:[#allocation2 + $0x10] sm:$0xff]  ;;  %v248_v4 = vpack.c.bf16 %v53_v2, %v52_v1  ;;  %v55_v5 = vld [vmem:[#allocation2 + $0x18] sm:$0xff]  ;;  %v50_v6 = vld [vmem:[%s489_s0] sm:$0xff]  ;;  %s371_s30 = smov 32   ;;  %vm159_vm1 = vcmask 523264  }
  0x2a   :  { %v252_v7 = vpack.c.bf16 %v55_v5, %v54_v3  ;;  %245 = vmatprep.mubr.msk.f32.mxu0 %vm65_vm0, %v50_v6  ;;  %v57_v8 = vld [vmem:[%s492_s3] sm:$0xff]  ;;  %v58_v10 = vld [vmem:[%s492_s3 + $0x8] sm:$0xff] }
  0x2b   :  { %v168_v9 = vld [vmem:[%s493_s4] sm:$0xff]  ;;  %249 = vmatprep.subr.bf16.mxu0 %v248_v4  ;;  %149 = vperm.xlu0 %265, %v57_v8   ;;  %v169_v11 = vld [vmem:[%s493_s4 + $0x8] sm:$0xff] }
  0x2c   :  { %251 = vmatpush3.bf16.msra.mxu0 %v248_v4  ;;  %172 = vrot.lane.b32.xlu1 %v168_v9, %s371_s30  ;;  %v51_v12 = vld [vmem:[%s489_s0 + $0x8] sm:$0xff]  ;;  %v228_v14 = vld [vmem:[#allocation5] ss:$0 sm:$0xff]  ;;  %s372_s0 = smov [#allocation7]  }
  0x2d   :  { %253 = vmatprep.subr.bf16.mxu0 %v252_v7  ;;  %s199_s3 = sshll.u32 %s372_s0, 4  ;;  %s200_s3 = int_to_ptr.vmem [resolvable:$true] %s199_s3 }
  0x2e   :  { %s314_s4 = scalar_lea.vmem %s200_s3, 256  ;;  %p319_p3 = scmp.lt.s32.totalorder %s200_s3, %s200_s3 }
  0x2f   :  { %154 = vperm.xlu0 %265, %v58_v10   ;;  %p315_p2 = scmp.ne.s32.totalorder %s200_s3, %s314_s4  ;;  %p320_p4 = scmp.lt.s32.totalorder %s314_s4, %s314_s4 }
  0x30   :  { %255 = vmatpush3.bf16.msra.mxu0 %v252_v7  ;;  %174 = vrot.lane.b32.xlu1 %v169_v11, %s371_s30 }
  0x31   :  { %p321_p5 = por %p320_p4, %p319_p3 }
  0x33   :  { %246 = vmatmul.mubr.msk.f32.vlgmr.msra.gmra.mrb[0].mxu0 %vm65_vm0, %v51_v12  ;;  %p322_p6 = pnand %p321_p5, %p315_p2 }
  0x9e   :  { %v173_v26 = vpop.permute.xlu1 %172 }
  0xaa   :  { %v150_v13 = vpop.permute.xlu0 %149 }
  0xae   :  { %v155_v18 = vpop.permute.xlu0 %154 }
 0x106   :  { %v247_v15 = vpop.f32.mrb[0].mxu0 }
 0x107   :  { %v144_v16 = vadd.f32 %v247_v15, %v228_v14  ;;  %v138_v17 = vpop.f32.mrb[1].mxu0 }
 0x108   :  { %v139_v19 = vadd.f32 %v228_v14, %v138_v17 }
 0x109   :  { %v158_v20 = vmul.f32 %v155_v18, %v144_v16 }
 0x10a   :  { %v157_v21 = vmul.f32 %v150_v13, %v139_v19 }
 0x10b   :  { %v163_v22 = vmul.f32 0.5, %v158_v20  ;;  %161 = vst.msk [vmem:[#allocation7 + $0x8] sm:$0xff] %vm159_vm1, %v158_v20 }
 0x10c   :  { %v162_v23 = vmul.f32 0.5, %v157_v21  ;;  %160 = vst.msk [vmem:[#allocation7] sm:$0xff] %vm159_vm1, %v157_v21 }
 0x10d   :  { %v166_v24 = vmul.f32 1.442695, %v163_v22 }
 0x10e   :  { %v164_v25 = vmul.f32 1.442695, %v162_v23 }
 0x10f   :  { %266 = vpow2.f32 %v166_v24 }
 0x110   :  { %268 = vpow2.f32 %v164_v25 }
 0x111   :  { %325 = shalt.err (!%p322_p6)
}
 0x112   :  { %s326_s15 = scalar_lea.hbm %s494_s5, 256 }
 0x113   :  { %p327_p7 = scmp.ne.s32.totalorder %s494_s5, %s326_s15  ;;  %p330_p8 = scmp.lt.u32.totalorder %s326_s15, %s494_s5 }
 0x115   :  { %p332_p9 = pnand %p330_p8, %p327_p7 }
 0x117   :  { %335 = shalt.err (!%p332_p9)
}
 0x118   :  { %205 = dma.vmem_to_hbm [thread:$0]  %s200_s3, 256, %s494_s5, [#allocation4], %s367_s7, %s367_s7, %s368_s8   ;;  %v175_v27 = vpop.permute.xlu1 %174 }
 0x119   :  { %v267_v28 = vpop.eup %266  ;;  %s373_s21 = smov 96   ;;  %s374_s22 = smov [#allocation8]  }
 0x11a   :  { %v269_v29 = vpop.eup %268  ;;  %v179_v30 = vmul.f32 %v267_v28, %v175_v27  ;;  %s211_s23 = sshll.u32 %s374_s22, 4  ;;  %s212_s23 = int_to_ptr.vmem [resolvable:$true] %s211_s23 }
 0x11b   :  { %v178_v31 = vmul.f32 %v269_v29, %v173_v26  ;;  %s336_s5 = scalar_lea.vmem %s212_s23, 256  ;;  %p341_p11 = scmp.lt.s32.totalorder %s212_s23, %s212_s23 }
 0x11c   :  { %184 = vrot.lane.b32.xlu1 %v179_v30, %s373_s21  ;;  %p337_p10 = scmp.ne.s32.totalorder %s212_s23, %s336_s5  ;;  %p342_p12 = scmp.lt.s32.totalorder %s336_s5, %s336_s5 }
 0x11d   :  { %182 = vrot.lane.b32.xlu0 %v178_v31, %s373_s21 }
 0x11e   :  { %p343_p13 = por %p342_p12, %p341_p11 }
 0x120   :  { %p344_p0 = pnand %p343_p13, %p337_p10 }
 0x18e   :  { %v185_v32 = vpop.permute.xlu1 %184 }
 0x18f   :  { %v189_v33 = vadd.f32 %v185_v32, %v158_v20  ;;  %v183_v34 = vpop.permute.xlu0 %182 }
 0x190   :  { %v188_v35 = vadd.f32 %v183_v34, %v157_v21 }
 0x191   :  { %v191_v36 = vmul.f32 %v189_v33, %v155_v18 }
 0x192   :  { %v190_v37 = vmul.f32 %v188_v35, %v150_v13 }
 0x193   :  { %193 = vst.msk [vmem:[#allocation8 + $0x8] sm:$0xff] %vm65_vm0, %v191_v36 }
 0x194   :  { %192 = vst.msk [vmem:[#allocation8] sm:$0xff] %vm65_vm0, %v190_v37 }
 0x195   :  { %347 = shalt.err (!%p344_p0)
}
 0x196   :  { %s348_s25 = scalar_lea.hbm %s495_s6, 256 }
 0x197   :  { %p349_p1 = scmp.ne.s32.totalorder %s495_s6, %s348_s25  ;;  %p352_p2 = scmp.lt.u32.totalorder %s348_s25, %s495_s6 }
 0x199   :  { %p354_p3 = pnand %p352_p2, %p349_p1 }
 0x19b   :  { %357 = shalt.err (!%p354_p3)
}
 0x19c   :  { %217 = dma.vmem_to_hbm [thread:$0]  %s212_s23, 256, %s495_s6, [#allocation9], %s367_s7, %s367_s7, %s368_s8  }
 0x19d   :  { %362 = dma.done.wait [#allocation4], 256  }
 0x19e   :  { %363 = vsyncadd [#allocation4], 4294967040 }
 0x19f   :  { %364 = dma.done.wait [#allocation9], 256  }
 0x1a0   :  { %365 = vsyncadd [#allocation9], 4294967040 }
 0x1a1   :  { %224 = vsyncpa [#allocation3], 1 }
 0x1a2   :  { %225 = vsyncpa [#allocation6], 1 }
 0x1a3   :  { %226 = vsyncpa [#allocation4], 1 }
 0x1a4   :  { %227 = vsyncpa [#allocation9], 1 }

</bundles_post_ra>
